<compile_context>
chip_gen: v6e
topology: v6e:2x2x1
jax: 0.10.0
libtpu: 0.0.40
codegen_flags: <defaults>
</compile_context>

<pallas_src>
import functools

import jax
import jax.numpy as jnp
from jax.experimental import pallas as pl
from jax.experimental.pallas import tpu as pltpu


_G = 8           # batch rows packed per lane-row of the grouped layout
_GRANULE = 1024  # batch tiles are multiples of this (=> grouped rows % 128 == 0)


def _mlp_kernel(xg_ref, w1_ref, b1_ref, w2_ref, b2_ref, w3_ref, b3_ref, og_ref):
    # All tiles are 2-D and lane-dense: (tbr, 40) @ (40, 256) -> (tbr, 256) etc.
    cdt = w1_ref.dtype                                   # bf16 (default) or f32
    x = xg_ref[...].astype(cdt)                          # VPU cast; MXU-native operands
    # fc1 + ReLU (f32 accumulation, f32 bias/ReLU)
    h = jnp.dot(x, w1_ref[...], preferred_element_type=jnp.float32) + b1_ref[...]
    h = jnp.maximum(h, 0.0).astype(cdt)
    # fc2 + ReLU
    h = jnp.dot(h, w2_ref[...], preferred_element_type=jnp.float32) + b2_ref[...]
    h = jnp.maximum(h, 0.0).astype(cdt)
    # fc3 + Tanh (tanh on the EUP, f32)
    y = jnp.dot(h, w3_ref[...], preferred_element_type=jnp.float32) + b3_ref[...]
    og_ref[...] = jnp.tanh(y).astype(og_ref.dtype)


def _round_up(n, m):
    return ((n + m - 1) // m) * m


def _cdiv(a, b):
    return -(-a // b)


def _choose_batch_tiling(batch, tile_b, granule=_GRANULE):
    """Balanced batch tiles; >=2 grid steps when possible (v7x megacore)."""
    b_min = _round_up(max(batch, 1), granule)
    n_tiles = max(1, _cdiv(b_min, tile_b))
    if n_tiles == 1 and b_min > granule:
        n_tiles = 2                      # give the second TensorCore half the batch
    tb = _round_up(_cdiv(b_min, n_tiles), granule)
    return tb, tb * n_tiles, n_tiles


def _block_diag(w_io, g):
    """(in, out) -> (g*in, g*out): g copies of w_io on the block diagonal."""
    i, o = w_io.shape
    eye = jnp.eye(g, dtype=w_io.dtype)
    return (eye[:, None, :, None] * w_io[None, :, None, :]).reshape(g * i, g * o)


@functools.partial(jax.jit,
                   static_argnames=("tile_b", "compute_dtype", "min_pallas_batch"))
def obstacle_avoidance_forward(x, params, *, tile_b=32768,
                               compute_dtype=jnp.bfloat16,
                               min_pallas_batch=1024):
    """Forward pass.

    x: (B, input_size) float32 (bf16 also accepted).
    params: PyTorch nn.Linear layout -- 'w*' is (out_features, in_features),
            'b*' is (out_features,).
    tile_b: batch-tile size (rounded to 1024).  Bigger tiles amortize the
            ~0.35 us per-grid-step overhead; the VMEM limit scales with it.
    compute_dtype: matmul operand dtype (bf16 default; accumulation is f32).
    min_pallas_batch: below this batch size the plain-XLA path is used.
    """
    w1, b1 = params["w1"], params["b1"]
    w2, b2 = params["w2"], params["b2"]
    w3, b3 = params["w3"], params["b3"]

    batch, in_size = x.shape
    hidden = w1.shape[0]
    out_size = w3.shape[0]

    # Small batches: padding + launch overhead exceed the work -> plain XLA.
    if batch < min_pallas_batch:
        return reference_forward(x, params)

    g = _G
    tb, b_pad, n_tiles = _choose_batch_tiling(batch, _round_up(tile_b, _GRANULE))
    tbr = tb // g  # grouped rows per grid step

    # Grouped views are pure metadata reshapes (row-major contiguous): no HBM
    # relayout pass.  A pad is materialized only when B is not tile-aligned.
    if b_pad != batch:
        x = jnp.pad(x, ((0, b_pad - batch), (0, 0)))
    xg = x.reshape(b_pad // g, g * in_size)                      # (B/8, 40)

    # Block-diagonal weights: xg @ Wg applies the same Linear to each of the 8
    # rows packed in a lane-row, so the "transpose" happens inside the MXU.
    cdt = jnp.dtype(compute_dtype)
    w1g = _block_diag(w1.T, g).astype(cdt)                        # (40, 256)
    w2g = _block_diag(w2.T, g).astype(cdt)                        # (256, 256)
    w3g = _block_diag(w3.T, g).astype(cdt)                        # (256, 24)
    b1g = jnp.tile(b1, g).reshape(1, g * hidden).astype(jnp.float32)
    b2g = jnp.tile(b2, g).reshape(1, g * hidden).astype(jnp.float32)
    b3g = jnp.tile(b3, g).reshape(1, g * out_size).astype(jnp.float32)

    # Constant index_map: parameters DMA'd once, VMEM-resident across the grid.
    const = lambda a: pl.BlockSpec(a.shape, lambda i: (0, 0))

    param_bytes = sum(int(a.size) * a.dtype.itemsize
                      for a in (w1g, b1g, w2g, b2g, w3g, b3g))
    cost = pl.CostEstimate(
        flops=2 * b_pad * (in_size * hidden + hidden * hidden + hidden * out_size),
        transcendentals=b_pad * out_size,
        bytes_accessed=int(b_pad * in_size * x.dtype.itemsize
                           + b_pad * out_size * 4 + param_bytes),
    )

    # VMEM budget scales with the tile: ~48 MiB at the default tb=32768 (fits
    # v7x's 64 MiB physical with headroom, above v5e/v6e 16/32 MiB scoped caps).
    vmem_limit = int(min(96 * 2**20, max(32 * 2**20, 1536 * tb)))

    out_g = pl.pallas_call(
        _mlp_kernel,
        out_shape=jax.ShapeDtypeStruct((b_pad // g, g * out_size), jnp.float32),
        grid=(n_tiles,),
        in_specs=[
            pl.BlockSpec((tbr, g * in_size), lambda i: (i, 0)),   # activations tiled on batch
            const(w1g), const(b1g),
            const(w2g), const(b2g),
            const(w3g), const(b3g),
        ],
        out_specs=pl.BlockSpec((tbr, g * out_size), lambda i: (i, 0)),
        compiler_params=pltpu.CompilerParams(
            dimension_semantics=("parallel",),     # megacore split on v7x
            vmem_limit_bytes=vmem_limit,
        ),
        cost_estimate=cost,
    )(xg, w1g, b1g, w2g, b2g, w3g, b3g)

    out = out_g.reshape(b_pad, out_size)                          # metadata-only
    return out[:batch] if b_pad != batch else out


def init_params(key, input_size=5, hidden_size=32, output_size=3):
    """Deterministic synthetic init (PyTorch-Linear-style uniform bounds)."""
    ks = jax.random.split(key, 6)

    def linear(kw, kb, fan_in, fan_out):
        bound = float(fan_in) ** -0.5
        w = jax.random.uniform(kw, (fan_out, fan_in), jnp.float32, -bound, bound)
        b = jax.random.uniform(kb, (fan_out,), jnp.float32, -bound, bound)
        return w, b

    w1, b1 = linear(ks[0], ks[1], input_size, hidden_size)
    w2, b2 = linear(ks[2], ks[3], hidden_size, hidden_size)
    w3, b3 = linear(ks[4], ks[5], hidden_size, output_size)
    return {"w1": w1, "b1": b1, "w2": w2, "b2": b2, "w3": w3, "b3": b3}


def reference_forward(x, params):
    h = jnp.maximum(x @ params["w1"].T + params["b1"], 0.0)
    h = jnp.maximum(h @ params["w2"].T + params["b2"], 0.0)
    return jnp.tanh(h @ params["w3"].T + params["b3"])


def reference_forward_quantized(x, params, dt):
    """Reference with the same operand quantization as the bf16 kernel path."""
    def lin(a, w, b):
        return jnp.dot(a.astype(dt), w.T.astype(dt),
                       preferred_element_type=jnp.float32) + b
    h = jnp.maximum(lin(x, params["w1"], params["b1"]), 0.0)
    h = jnp.maximum(lin(h, params["w2"], params["b2"]), 0.0)
    return jnp.tanh(lin(h, params["w3"], params["b3"]))


if __name__ == "__main__":
    key = jax.random.PRNGKey(0)
    k_params, k1, k2 = jax.random.split(key, 3)

    input_size, hidden_size, output_size = 5, 32, 3
    params = init_params(k_params, input_size, hidden_size, output_size)

    # Case 1: tiny batch, f32 compute (tight check of the grouped/block-diagonal
    # math; exercises the pad-to-tile path and a single-step grid).
    x_small = jax.random.normal(k1, (8, input_size), jnp.float32)
    out_small = jax.block_until_ready(
        obstacle_avoidance_forward(x_small, params,
                                   compute_dtype=jnp.float32,
                                   min_pallas_batch=0))
    ref_small = reference_forward(x_small, params)
    assert out_small.shape == (8, output_size)
    err1 = float(jnp.max(jnp.abs(out_small - ref_small)))
    assert jnp.allclose(out_small, ref_small, atol=1e-4, rtol=1e-4), err1

    # Case 2: ragged multi-tile batch, default bf16 operands (3-step pipelined
    # grid, "parallel" batch axis, pad + slice path).
    x_big = jax.random.normal(k2, (2500, input_size), jnp.float32)
    out_big = jax.block_until_ready(
        obstacle_avoidance_forward(x_big, params, tile_b=1024, min_pallas_batch=0))
    assert out_big.shape == (2500, output_size)
    ref_big_q = reference_forward_quantized(x_big, params, jnp.bfloat16)
    ref_big = reference_forward(x_big, params)
    err2 = float(jnp.max(jnp.abs(out_big - ref_big_q)))
    err3 = float(jnp.max(jnp.abs(out_big - ref_big)))
    assert jnp.allclose(out_big, ref_big_q, atol=5e-3, rtol=0.0), err2
    assert jnp.allclose(out_big, ref_big, atol=5e-2, rtol=0.0), err3

    # Case 3: small-batch dispatch guard -> plain XLA path.
    out_guard = jax.block_until_ready(obstacle_avoidance_forward(x_small, params))
    assert jnp.allclose(out_guard, ref_small, atol=1e-5, rtol=1e-5)

    print("KERNEL_OK")
</pallas_src>

<mosaic_0001>
module attributes {stable_mosaic.version = 11 : i64} {
  func.func @_mlp_kernel(%arg0: i32, %arg1: memref<128x40xf32, #tpu.memory_space<vmem>>, %arg2: memref<40x256xf32, #tpu.memory_space<vmem>>, %arg3: memref<1x256xf32, #tpu.memory_space<vmem>>, %arg4: memref<256x256xf32, #tpu.memory_space<vmem>>, %arg5: memref<1x256xf32, #tpu.memory_space<vmem>>, %arg6: memref<256x24xf32, #tpu.memory_space<vmem>>, %arg7: memref<1x24xf32, #tpu.memory_space<vmem>>, %arg8: memref<128x24xf32, #tpu.memory_space<vmem>>) attributes {dimension_semantics = [#tpu.dimension_semantics<parallel>], iteration_bounds = array<i64: 1>, scalar_prefetch = 0 : i64, scratch_operands = 0 : i64, tpu.core_type = #tpu.core_type<tc>, window_params = [{transform_indices = @transform_0, window_bounds = array<i64: 128, 40>}, {pipeline_mode = #tpu.pipeline_mode<synchronous>, transform_indices = @transform_1, window_bounds = array<i64: 40, 256>}, {pipeline_mode = #tpu.pipeline_mode<synchronous>, transform_indices = @transform_2, window_bounds = array<i64: 1, 256>}, {pipeline_mode = #tpu.pipeline_mode<synchronous>, transform_indices = @transform_3, window_bounds = array<i64: 256, 256>}, {pipeline_mode = #tpu.pipeline_mode<synchronous>, transform_indices = @transform_4, window_bounds = array<i64: 1, 256>}, {pipeline_mode = #tpu.pipeline_mode<synchronous>, transform_indices = @transform_5, window_bounds = array<i64: 256, 24>}, {pipeline_mode = #tpu.pipeline_mode<synchronous>, transform_indices = @transform_6, window_bounds = array<i64: 1, 24>}, {transform_indices = @transform_7, window_bounds = array<i64: 128, 24>}]} {
    %c0 = arith.constant 0 : index
    %c0_0 = arith.constant 0 : index
    %0 = vector.load %arg1[%c0, %c0_0] : memref<128x40xf32, #tpu.memory_space<vmem>>, vector<128x40xf32>
    %c0_1 = arith.constant 0 : index
    %c0_2 = arith.constant 0 : index
    %1 = vector.load %arg2[%c0_1, %c0_2] : memref<40x256xf32, #tpu.memory_space<vmem>>, vector<40x256xf32>
    %cst = arith.constant dense<0.000000e+00> : vector<128x256xf32>
    %2 = tpu.matmul %0, %1, %cst {dimension_numbers = #tpu.dot_dimension_numbers<[1], [0], [0], [1], [0, 0, 1, 1], [], []>} : vector<128x40xf32>, vector<40x256xf32>, vector<128x256xf32> -> vector<128x256xf32>
    %c0_3 = arith.constant 0 : index
    %c0_4 = arith.constant 0 : index
    %3 = vector.load %arg3[%c0_3, %c0_4] : memref<1x256xf32, #tpu.memory_space<vmem>>, vector<1x256xf32>
    %4 = vector.broadcast %3 : vector<1x256xf32> to vector<128x256xf32>
    %5 = arith.addf %2, %4 : vector<128x256xf32>
    %cst_5 = arith.constant 0.000000e+00 : f32
    %6 = vector.broadcast %cst_5 : f32 to vector<128x256xf32>
    %7 = arith.maximumf %5, %6 : vector<128x256xf32>
    %c0_6 = arith.constant 0 : index
    %c0_7 = arith.constant 0 : index
    %8 = vector.load %arg4[%c0_6, %c0_7] : memref<256x256xf32, #tpu.memory_space<vmem>>, vector<256x256xf32>
    %cst_8 = arith.constant dense<0.000000e+00> : vector<128x256xf32>
    %9 = tpu.matmul %7, %8, %cst_8 {dimension_numbers = #tpu.dot_dimension_numbers<[1], [0], [0], [1], [0, 0, 1, 1], [], []>} : vector<128x256xf32>, vector<256x256xf32>, vector<128x256xf32> -> vector<128x256xf32>
    %c0_9 = arith.constant 0 : index
    %c0_10 = arith.constant 0 : index
    %10 = vector.load %arg5[%c0_9, %c0_10] : memref<1x256xf32, #tpu.memory_space<vmem>>, vector<1x256xf32>
    %11 = vector.broadcast %10 : vector<1x256xf32> to vector<128x256xf32>
    %12 = arith.addf %9, %11 : vector<128x256xf32>
    %cst_11 = arith.constant 0.000000e+00 : f32
    %13 = vector.broadcast %cst_11 : f32 to vector<128x256xf32>
    %14 = arith.maximumf %12, %13 : vector<128x256xf32>
    %c0_12 = arith.constant 0 : index
    %c0_13 = arith.constant 0 : index
    %15 = vector.load %arg6[%c0_12, %c0_13] : memref<256x24xf32, #tpu.memory_space<vmem>>, vector<256x24xf32>
    %cst_14 = arith.constant dense<0.000000e+00> : vector<128x24xf32>
    %16 = tpu.matmul %14, %15, %cst_14 {dimension_numbers = #tpu.dot_dimension_numbers<[1], [0], [0], [1], [0, 0, 1, 1], [], []>} : vector<128x256xf32>, vector<256x24xf32>, vector<128x24xf32> -> vector<128x24xf32>
    %c0_15 = arith.constant 0 : index
    %c0_16 = arith.constant 0 : index
    %17 = vector.load %arg7[%c0_15, %c0_16] : memref<1x24xf32, #tpu.memory_space<vmem>>, vector<1x24xf32>
    %18 = vector.broadcast %17 : vector<1x24xf32> to vector<128x24xf32>
    %19 = arith.addf %16, %18 : vector<128x24xf32>
    %20 = math.tanh %19 : vector<128x24xf32>
    %c0_17 = arith.constant 0 : index
    %c0_18 = arith.constant 0 : index
    %21 = vector.load %arg8[%c0_17, %c0_18] : memref<128x24xf32, #tpu.memory_space<vmem>>, vector<128x24xf32>
    tpu.vector_store %arg8[%c0_17, %c0_18], %20 {strides = array<i32>} : memref<128x24xf32, #tpu.memory_space<vmem>>, vector<128x24xf32>,
    return
  }
  func.func @transform_0(%arg0: i32) -> (i32, i32) {
    %c0_i32 = arith.constant 0 : i32
    %c0_i32_0 = arith.constant 0 : i32
    return %arg0, %c0_i32 : i32, i32
  }
  func.func @transform_1(%arg0: i32) -> (i32, i32) {
    %c0_i32 = arith.constant 0 : i32
    %c0_i32_0 = arith.constant 0 : i32
    %c0_i32_1 = arith.constant 0 : i32
    return %c0_i32, %c0_i32_0 : i32, i32
  }
  func.func @transform_2(%arg0: i32) -> (i32, i32) {
    %c0_i32 = arith.constant 0 : i32
    %c0_i32_0 = arith.constant 0 : i32
    %c0_i32_1 = arith.constant 0 : i32
    return %c0_i32, %c0_i32_0 : i32, i32
  }
  func.func @transform_3(%arg0: i32) -> (i32, i32) {
    %c0_i32 = arith.constant 0 : i32
    %c0_i32_0 = arith.constant 0 : i32
    %c0_i32_1 = arith.constant 0 : i32
    return %c0_i32, %c0_i32_0 : i32, i32
  }
  func.func @transform_4(%arg0: i32) -> (i32, i32) {
    %c0_i32 = arith.constant 0 : i32
    %c0_i32_0 = arith.constant 0 : i32
    %c0_i32_1 = arith.constant 0 : i32
    return %c0_i32, %c0_i32_0 : i32, i32
  }
  func.func @transform_5(%arg0: i32) -> (i32, i32) {
    %c0_i32 = arith.constant 0 : i32
    %c0_i32_0 = arith.constant 0 : i32
    %c0_i32_1 = arith.constant 0 : i32
    return %c0_i32, %c0_i32_0 : i32, i32
  }
  func.func @transform_6(%arg0: i32) -> (i32, i32) {
    %c0_i32 = arith.constant 0 : i32
    %c0_i32_0 = arith.constant 0 : i32
    %c0_i32_1 = arith.constant 0 : i32
    return %c0_i32, %c0_i32_0 : i32, i32
  }
  func.func @transform_7(%arg0: i32) -> (i32, i32) {
    %c0_i32 = arith.constant 0 : i32
    %c0_i32_0 = arith.constant 0 : i32
    return %arg0, %c0_i32 : i32, i32
  }
}

</mosaic_0001>

<bundles_post_ra>
// kernel: tile.18
= control target key start
LH: loop header
LB: loop body
LE: loop exit
PB: predicated region body
PF: predicated region fallthrough
CT: control target
= control target key end

     0   :  { %s22_s0 = inlined_call_operand.vmem [shape: f32[32], index: 0, kind: input, shape index: {}]   ;;  %s23_s1 = inlined_call_operand.vmem [shape: f32[8,32], index: 1, kind: output, shape index: {}]  }
   0x1   :  { %v4_v0 = vld [vmem:[%s22_s0] ss:$0 sm:$0xff] }
   0x2   :  { %5 = vst [vmem:[%s23_s1] sm:$0xff] %v4_v0 }

// kernel: tile.19
= control target key start
LH: loop header
LB: loop body
LE: loop exit
PB: predicated region body
PF: predicated region fallthrough
CT: control target
= control target key end

     0   :  { %s7_s6 = smov 3  ;;  %s14_s9 = smov 3  ;;  %vm4_vm0 = vcmask 261120   ;;  %vm11_vm1 = vcmask 1048320   ;;  %vm18_vm2 = vcmask 785920   ;;  %vm25_vm3 = vcmask 523520   ;;  %s79_s0 = inlined_call_operand.vmem [shape: f32[8,32], index: 0, kind: input, shape index: {}]   ;;  %s80_s1 = inlined_call_operand.vmem [shape: f32[1,256], index: 1, kind: output, shape index: {}]  }
   0x1   :  { %v41_v0 = vld [vmem:[%s79_s0 + $0x3] ss:$4 sm:%s7_s6]   ;;  %s48_s10 = smov 96   ;;  %s21_s11 = smov 3  ;;  %v42_v1 = vld [vmem:[%s79_s0 + $0x2] ss:$4 sm:%s14_s9]  }
   0x2   :  { %9 = vrot.lane.b32.xlu0 %v41_v0, %s48_s10  ;;  %v43_v2 = vld [vmem:[%s79_s0 + $0x1] ss:$4 sm:%s21_s11]   ;;  %s2_s16 = smov 3  ;;  %s49_s17 = smov 32  }
   0x3   :  { %23 = vrot.lane.b32.xlu1 %v43_v2, %s49_s17  ;;  %v3_v3 = vld [vmem:[%s79_s0] ss:$4 sm:%s2_s16]   ;;  %s50_s0 = smov 64  }
   0x4   :  { %5 = vst.msk [vmem:[#allocation0] ss:$8 sm:$0x3] %vm4_vm0, %v3_v3  }
   0x6   :  { %16 = vrot.lane.b32.xlu0 %v42_v1, %s50_s0 }
  0x74   :  { %v10_v4 = vpop.permute.xlu0 %9  }
  0x75   :  { %12 = vst.msk [vmem:[#allocation0] ss:$8 sm:$0x3] %vm11_vm1, %v10_v4   ;;  %v24_v5 = vpop.permute.xlu1 %23  }
  0x78   :  { %v17_v6 = vpop.permute.xlu0 %16  }
  0x79   :  { %19 = vst.msk [vmem:[#allocation0] ss:$8 sm:$0x3] %vm18_vm2, %v17_v6  }
  0x7a   :  { %26 = vst.msk [vmem:[#allocation0] ss:$8 sm:$0x3] %vm25_vm3, %v24_v5  }
  0x81   :  { %v31_v7 = vld [vmem:[#allocation0] sm:$0x1]  ;;  %v36_v8 = vld [vmem:[#allocation0 + $0x8] sm:$0x1] }
  0x82   :  { %34 = vst [vmem:[%s80_s1] sm:$0x1] %v31_v7  ;;  %44 = vst [vmem:[%s80_s1 + $0x1] sm:$0x1] %v36_v8 }

// kernel: tile.28
= control target key start
LH: loop header
LB: loop body
LE: loop exit
PB: predicated region body
PF: predicated region fallthrough
CT: control target
= control target key end

     0   :  { %s22_s0 = inlined_call_operand.vmem [shape: f32[3], index: 0, kind: input, shape index: {}]   ;;  %s23_s1 = inlined_call_operand.vmem [shape: f32[8,3], index: 1, kind: output, shape index: {}]  }
   0x1   :  { %v4_v0 = vld [vmem:[%s22_s0] ss:$0 sm:$0xff] }
   0x2   :  { %5 = vst [vmem:[%s23_s1] sm:$0xff] %v4_v0 }

// kernel: tile.29
= control target key start
LH: loop header
LB: loop body
LE: loop exit
PB: predicated region body
PF: predicated region fallthrough
CT: control target
= control target key end

     0   :  { %s69_s10 = smov 21   ;;  %s70_s11 = smov 15   ;;  %vm3_vm0 = vcmask 23552   ;;  %vm9_vm1 = vcmask 195752   ;;  %vm15_vm2 = vcmask 171152   ;;  %vm21_vm3 = vcmask 146552   ;;  %s113_s0 = inlined_call_operand.vmem [shape: f32[8,3], index: 0, kind: input, shape index: {}]   ;;  %s114_s1 = inlined_call_operand.vmem [shape: f32[1,24], index: 1, kind: output, shape index: {}]  }
   0x1   :  { %v55_v0 = vld [vmem:[%s113_s0 + $0x7] sm:$0x1]   ;;  %v57_v1 = vld [vmem:[%s113_s0 + $0x5] sm:$0x1]   ;;  %v56_v2 = vld [vmem:[%s113_s0 + $0x6] sm:$0x1]  }
   0x2   :  { %7 = vrot.lane.b32.xlu0 %v55_v0, %s69_s10  ;;  %19 = vrot.lane.b32.xlu1 %v57_v1, %s70_s11  ;;  %v58_v3 = vld [vmem:[%s113_s0 + $0x4] sm:$0x1]   ;;  %v2_v4 = vld [vmem:[%s113_s0] sm:$0x1]   ;;  %s71_s18 = smov 18   ;;  %s72_s19 = smov 12  }
   0x3   :  { %4 = vst.msk [vmem:[#allocation0] sm:$0x1] %vm3_vm0, %v2_v4   ;;  %v59_v5 = vld [vmem:[%s113_s0 + $0x3] sm:$0x1]   ;;  %v60_v6 = vld [vmem:[%s113_s0 + $0x2] sm:$0x1]  }
   0x4   :  { %s73_s24 = smov 9   ;;  %s74_s25 = smov 6   ;;  %v61_v7 = vld [vmem:[%s113_s0 + $0x1] sm:$0x1]   ;;  %vm27_vm4 = vcmask 121952   ;;  %vm33_vm5 = vcmask 97352  }
   0x5   :  { %s75_s0 = smov 3   ;;  %vm39_vm6 = vcmask 72752   ;;  %vm45_vm7 = vcmask 48152  }
   0x6   :  { %13 = vrot.lane.b32.xlu0 %v56_v2, %s71_s18  ;;  %25 = vrot.lane.b32.xlu1 %v58_v3, %s72_s19 }
   0xa   :  { %31 = vrot.lane.b32.xlu0 %v59_v5, %s73_s24  ;;  %37 = vrot.lane.b32.xlu1 %v60_v6, %s74_s25 }
   0xe   :  { %43 = vrot.lane.b32.xlu0 %v61_v7, %s75_s0 }
  0x74   :  { %v8_v8 = vpop.permute.xlu0 %7   ;;  %v20_v9 = vpop.permute.xlu1 %19  }
  0x75   :  { %10 = vst.msk [vmem:[#allocation0] sm:$0x1] %vm9_vm1, %v8_v8  }
  0x78   :  { %v14_v10 = vpop.permute.xlu0 %13   ;;  %v26_v11 = vpop.permute.xlu1 %25  }
  0x79   :  { %16 = vst.msk [vmem:[#allocation0] sm:$0x1] %vm15_vm2, %v14_v10  }
  0x7a   :  { %22 = vst.msk [vmem:[#allocation0] sm:$0x1] %vm21_vm3, %v20_v9  }
  0x7b   :  { %28 = vst.msk [vmem:[#allocation0] sm:$0x1] %vm27_vm4, %v26_v11  }
  0x7c   :  { %v32_v12 = vpop.permute.xlu0 %31   ;;  %v38_v13 = vpop.permute.xlu1 %37  }
  0x7d   :  { %34 = vst.msk [vmem:[#allocation0] sm:$0x1] %vm33_vm5, %v32_v12  }
  0x7e   :  { %40 = vst.msk [vmem:[#allocation0] sm:$0x1] %vm39_vm6, %v38_v13  }
  0x80   :  { %v44_v14 = vpop.permute.xlu0 %43  }
  0x81   :  { %46 = vst.msk [vmem:[#allocation0] sm:$0x1] %vm45_vm7, %v44_v14  }
  0x88   :  { %v51_v15 = vld [vmem:[#allocation0] sm:$0x1] }
  0x89   :  { %54 = vst [vmem:[%s114_s1] sm:$0x1] %v51_v15 }

// kernel: obstacle_avoidance_forward.1
= control target key start
LH: loop header
LB: loop body
LE: loop exit
PB: predicated region body
PF: predicated region fallthrough
CT: control target
= control target key end

     0   :  { %v958_v3 = vmov 0.0   ;;  %vm64_vm0 = vcmask 326656   ;;  %vm775_vm1 = vcmask 195584   ;;  %s1676_s1 = inlined_call_operand.vmem [shape: f32[40,256], index: 1, kind: input, shape index: {}]   ;;  %s1677_s0 = inlined_call_operand.vmem [shape: f32[128,40], index: 0, kind: input, shape index: {}]   ;;  %s1678_s3 = inlined_call_operand.vmem [shape: f32[256,256], index: 3, kind: input, shape index: {}]   ;;  %s1679_s5 = inlined_call_operand.vmem [shape: f32[256,24], index: 5, kind: input, shape index: {}]   ;;  %s1680_s2 = inlined_call_operand.vmem [shape: f32[1,256], index: 2, kind: input, shape index: {}]   ;;  %s1681_s4 = inlined_call_operand.vmem [shape: f32[1,256], index: 4, kind: input, shape index: {}]   ;;  %s1682_s6 = inlined_call_operand.vmem [shape: f32[1,24], index: 6, kind: input, shape index: {}]   ;;  %s1683_s7 = inlined_call_operand.vmem [shape: f32[128,24], index: 7, kind: output, shape index: {}]  }
   0x1   :  { %v51_v0 = vld [vmem:[%s1676_s1 + $0x48] sm:$0xff]  ;;  %v50_v1 = vld [vmem:[%s1676_s1 + $0x40] sm:$0xff]  ;;  %v49_v2 = vld [vmem:[%s1676_s1 + $0x38] sm:$0xff]  ;;  %177 = vmatprep.mubr.f32.mxu0 %v958_v3 }
   0x2   :  { %135 = vmatprep.subr.mxu0 %v51_v0  ;;  %v48_v4 = vld [vmem:[%s1676_s1 + $0x30] sm:$0xff]  ;;  %v47_v5 = vld [vmem:[%s1676_s1 + $0x28] sm:$0xff]  ;;  %v46_v6 = vld [vmem:[%s1676_s1 + $0x20] sm:$0xff] }
   0x3   :  { %136 = vmatpush1.msra.mxu0 %v50_v1  ;;  %v45_v7 = vld [vmem:[%s1676_s1 + $0x18] sm:$0xff]  ;;  %v44_v8 = vld [vmem:[%s1676_s1 + $0x10] sm:$0xff]  ;;  %v43_v9 = vld [vmem:[%s1676_s1 + $0x8] sm:$0xff] }
   0x4   :  { %137 = vmatprep.subr.mxu0 %v49_v2  ;;  %v42_v10 = vld [vmem:[%s1676_s1] sm:$0xff]  ;;  %v337_v12 = vld [vmem:[%s1678_s3 + $0xf8] sm:$0xff]  ;;  %v336_v13 = vld [vmem:[%s1678_s3 + $0xf0] sm:$0xff] }
   0x5   :  { %138 = vmatpush1.msra.mxu0 %v48_v4  ;;  %v26_v11 = vld [vmem:[%s1677_s0] sm:$0xff]  ;;  %382 = vmatprep.subr.mxu1 %v337_v12  ;;  %v335_v14 = vld [vmem:[%s1678_s3 + $0xe8] sm:$0xff]  ;;  %v333_v16 = vld [vmem:[%s1678_s3 + $0xd8] sm:$0xff] }
   0x6   :  { %139 = vmatprep.subr.mxu0 %v47_v5  ;;  %v334_v15 = vld [vmem:[%s1678_s3 + $0xe0] sm:$0xff]  ;;  %383 = vmatpush1.msra.mxu1 %v336_v13  ;;  %v332_v17 = vld [vmem:[%s1678_s3 + $0xd0] sm:$0xff]  ;;  %v27_v18 = vld [vmem:[%s1677_s0 + $0x8] sm:$0xff] }
   0x7   :  { %140 = vmatpush1.msra.mxu0 %v46_v6  ;;  %384 = vmatprep.subr.mxu1 %v335_v14  ;;  %v331_v19 = vld [vmem:[%s1678_s3 + $0xc8] sm:$0xff]  ;;  %v330_v20 = vld [vmem:[%s1678_s3 + $0xc0] sm:$0xff]  ;;  %v329_v21 = vld [vmem:[%s1678_s3 + $0xb8] sm:$0xff] }
   0x8   :  { %141 = vmatprep.subr.mxu0 %v45_v7  ;;  %385 = vmatpush1.msra.mxu1 %v334_v15  ;;  %v328_v22 = vld [vmem:[%s1678_s3 + $0xb0] sm:$0xff]  ;;  %v327_v24 = vld [vmem:[%s1678_s3 + $0xa8] sm:$0xff]  ;;  %v326_v25 = vld [vmem:[%s1678_s3 + $0xa0] sm:$0xff] }
   0x9   :  { %142 = vmatpush1.msra.mxu0 %v44_v8  ;;  %386 = vmatprep.subr.mxu1 %v333_v16  ;;  %v28_v23 = vld [vmem:[%s1677_s0 + $0x10] sm:$0xff]  ;;  %v325_v26 = vld [vmem:[%s1678_s3 + $0x98] sm:$0xff]  ;;  %v323_v29 = vld [vmem:[%s1678_s3 + $0x88] sm:$0xff] }
   0xa   :  { %143 = vmatprep.subr.mxu0 %v43_v9  ;;  %387 = vmatpush1.msra.mxu1 %v332_v17  ;;  %v324_v27 = vld [vmem:[%s1678_s3 + $0x90] sm:$0xff]  ;;  %v29_v28 = vld [vmem:[%s1677_s0 + $0x18] sm:$0xff]  ;;  %v322_v30 = vld [vmem:[%s1678_s3 + $0x80] sm:$0xff] }
   0xb   :  { %144 = vmatpush1.msra.mxu0 %v42_v10  ;;  %388 = vmatprep.subr.mxu1 %v331_v19  ;;  %v321_v31 = vld [vmem:[%s1678_s3 + $0x78] sm:$0xff]  ;;  %v320_v32 = vld [vmem:[%s1678_s3 + $0x70] sm:$0xff]  ;;  %v30_v33 = vld [vmem:[%s1677_s0 + $0x20] sm:$0xff] }
   0xc   :  { %796 = vmatmul.mubr.msk.f32.vlgmr.msra.gmra.mxu0 %vm64_vm0, %v26_v11  ;;  %389 = vmatpush1.msra.mxu1 %v330_v20  ;;  %v319_v34 = vld [vmem:[%s1678_s3 + $0x68] sm:$0xff]  ;;  %v318_v35 = vld [vmem:[%s1678_s3 + $0x60] sm:$0xff]  ;;  %v317_v36 = vld [vmem:[%s1678_s3 + $0x58] sm:$0xff] }
   0xd   :  { %183 = vmatprep.mubr.f32.mxu0 %v958_v3  ;;  %390 = vmatprep.subr.mxu1 %v329_v21  ;;  %v316_v37 = vld [vmem:[%s1678_s3 + $0x50] sm:$0xff]  ;;  %v31_v38 = vld [vmem:[%s1677_s0 + $0x28] sm:$0xff]  ;;  %v314_v40 = vld [vmem:[%s1678_s3 + $0x40] sm:$0xff] }
   0xe   :  { %391 = vmatpush1.msra.mxu1 %v328_v22  ;;  %v315_v39 = vld [vmem:[%s1678_s3 + $0x48] sm:$0xff]  ;;  %v313_v41 = vld [vmem:[%s1678_s3 + $0x38] sm:$0xff]  ;;  %v312_v42 = vld [vmem:[%s1678_s3 + $0x30] sm:$0xff] }
   0xf   :  { %392 = vmatprep.subr.mxu1 %v327_v24  ;;  %v32_v43 = vld [vmem:[%s1677_s0 + $0x30] sm:$0xff]  ;;  %v311_v44 = vld [vmem:[%s1678_s3 + $0x28] sm:$0xff]  ;;  %v310_v45 = vld [vmem:[%s1678_s3 + $0x20] sm:$0xff] }
  0x10   :  { %797 = vmatmul.mubr.msk.f32.gmra.mxu0 %vm64_vm0, %v27_v18  ;;  %393 = vmatpush1.msra.mxu1 %v326_v25  ;;  %v309_v46 = vld [vmem:[%s1678_s3 + $0x18] sm:$0xff]  ;;  %v308_v47 = vld [vmem:[%s1678_s3 + $0x10] sm:$0xff]  ;;  %v307_v49 = vld [vmem:[%s1678_s3 + $0x8] sm:$0xff] }
  0x11   :  { %189 = vmatprep.mubr.f32.mxu0 %v958_v3  ;;  %394 = vmatprep.subr.mxu1 %v325_v26  ;;  %v33_v48 = vld [vmem:[%s1677_s0 + $0x38] sm:$0xff]  ;;  %v306_v50 = vld [vmem:[%s1678_s3] sm:$0xff]  ;;  %v368_v52 = vld [vmem:[%s1678_s3 + $0x1f0] sm:$0xff] }
  0x12   :  { %395 = vmatpush1.msra.mxu1 %v324_v27  ;;  %v369_v51 = vld [vmem:[%s1678_s3 + $0x1f8] sm:$0xff]  ;;  %v34_v53 = vld [vmem:[%s1677_s0 + $0x40] sm:$0xff]  ;;  %v367_v54 = vld [vmem:[%s1678_s3 + $0x1e8] sm:$0xff] }
  0x13   :  { %396 = vmatprep.subr.mxu1 %v323_v29  ;;  %v366_v55 = vld [vmem:[%s1678_s3 + $0x1e0] sm:$0xff]  ;;  %v365_v56 = vld [vmem:[%s1678_s3 + $0x1d8] sm:$0xff]  ;;  %v364_v57 = vld [vmem:[%s1678_s3 + $0x1d0] sm:$0xff] }
  0x14   :  { %798 = vmatmul.mubr.msk.f32.gmra.mxu0 %vm64_vm0, %v28_v23  ;;  %397 = vmatpush1.msra.mxu1 %v322_v30  ;;  %v35_v58 = vld [vmem:[%s1677_s0 + $0x48] sm:$0xff]  ;;  %v362_v60 = vld [vmem:[%s1678_s3 + $0x1c0] sm:$0xff]  ;;  %v361_v61 = vld [vmem:[%s1678_s3 + $0x1b8] sm:$0xff] }
  0x15   :  { %195 = vmatprep.mubr.f32.mxu0 %v958_v3  ;;  %398 = vmatprep.subr.mxu1 %v321_v31  ;;  %v363_v59 = vld [vmem:[%s1678_s3 + $0x1c8] sm:$0xff]  ;;  %v360_v62 = vld [vmem:[%s1678_s3 + $0x1b0] sm:$0xff]  ;;  %v358_v1 = vld [vmem:[%s1678_s3 + $0x1a0] sm:$0xff] }
  0x16   :  { %399 = vmatpush1.msra.mxu1 %v320_v32  ;;  %v36_v63 = vld [vmem:[%s1677_s0 + $0x50] sm:$0xff]  ;;  %v359_v0 = vld [vmem:[%s1678_s3 + $0x1a8] sm:$0xff]  ;;  %v357_v2 = vld [vmem:[%s1678_s3 + $0x198] sm:$0xff] }
  0x17   :  { %400 = vmatprep.subr.mxu1 %v319_v34  ;;  %v356_v4 = vld [vmem:[%s1678_s3 + $0x190] sm:$0xff]  ;;  %v37_v5 = vld [vmem:[%s1677_s0 + $0x58] sm:$0xff]  ;;  %v355_v6 = vld [vmem:[%s1678_s3 + $0x188] sm:$0xff] }
  0x18   :  { %799 = vmatmul.mubr.msk.f32.gmra.mxu0 %vm64_vm0, %v29_v28  ;;  %401 = vmatpush1.msra.mxu1 %v318_v35  ;;  %v354_v7 = vld [vmem:[%s1678_s3 + $0x180] sm:$0xff]  ;;  %v353_v8 = vld [vmem:[%s1678_s3 + $0x178] sm:$0xff]  ;;  %v352_v9 = vld [vmem:[%s1678_s3 + $0x170] sm:$0xff] }
  0x19   :  { %201 = vmatprep.mubr.f32.mxu0 %v958_v3  ;;  %402 = vmatprep.subr.mxu1 %v317_v36  ;;  %v38_v10 = vld [vmem:[%s1677_s0 + $0x60] sm:$0xff]  ;;  %v351_v11 = vld [vmem:[%s1678_s3 + $0x168] sm:$0xff]  ;;  %v349_v13 = vld [vmem:[%s1678_s3 + $0x158] sm:$0xff] }
  0x1a   :  { %403 = vmatpush1.msra.mxu1 %v316_v37  ;;  %v350_v12 = vld [vmem:[%s1678_s3 + $0x160] sm:$0xff]  ;;  %v348_v14 = vld [vmem:[%s1678_s3 + $0x150] sm:$0xff]  ;;  %v39_v15 = vld [vmem:[%s1677_s0 + $0x68] sm:$0xff] }
  0x1b   :  { %404 = vmatprep.subr.mxu1 %v315_v39  ;;  %v347_v16 = vld [vmem:[%s1678_s3 + $0x148] sm:$0xff]  ;;  %v346_v17 = vld [vmem:[%s1678_s3 + $0x140] sm:$0xff]  ;;  %v40_v18 = vld [vmem:[%s1677_s0 + $0x70] sm:$0xff] }
  0x1c   :  { %800 = vmatmul.mubr.msk.f32.gmra.mxu0 %vm64_vm0, %v30_v33  ;;  %405 = vmatpush1.msra.mxu1 %v314_v40  ;;  %v41_v19 = vld [vmem:[%s1677_s0 + $0x78] sm:$0xff]  ;;  %v344_v21 = vld [vmem:[%s1678_s3 + $0x130] sm:$0xff]  ;;  %v342_v22 = vld [vmem:[%s1678_s3 + $0x120] sm:$0xff] }
  0x1d   :  { %207 = vmatprep.mubr.f32.mxu0 %v958_v3  ;;  %406 = vmatprep.subr.mxu1 %v313_v41  ;;  %v345_v20 = vld [vmem:[%s1678_s3 + $0x138] sm:$0xff]  ;;  %v340_v24 = vld [vmem:[%s1678_s3 + $0x110] sm:$0xff]  ;;  %v339_v25 = vld [vmem:[%s1678_s3 + $0x108] sm:$0xff] }
  0x1e   :  { %407 = vmatpush1.msra.mxu1 %v312_v42  ;;  %v341_v23 = vld [vmem:[%s1678_s3 + $0x118] sm:$0xff]  ;;  %v338_v26 = vld [vmem:[%s1678_s3 + $0x100] sm:$0xff]  ;;  %v1312_v29 = vld [vmem:[%s1679_s5 + $0xf0] sm:$0xff] }
  0x1f   :  { %408 = vmatprep.subr.mxu1 %v311_v44  ;;  %v606_v27 = vld [vmem:[%s1679_s5 + $0xf8] sm:$0xff]  ;;  %v1317_v30 = vld [vmem:[%s1679_s5 + $0x70] sm:$0xff]  ;;  %v1323_v31 = vld [vmem:[%s1679_s5 + $0xe8] sm:$0xff] }
  0x20   :  { %801 = vmatmul.mubr.msk.f32.gmra.mxu0 %vm64_vm0, %v31_v38  ;;  %409 = vmatpush1.msra.mxu1 %v310_v45  ;;  %v1307_v28 = vld [vmem:[%s1679_s5 + $0x78] sm:$0xff]  ;;  %v1329_v32 = vld [vmem:[%s1679_s5 + $0x68] sm:$0xff]  ;;  %v1335_v33 = vld [vmem:[%s1679_s5 + $0xe0] sm:$0xff] }
  0x21   :  { %213 = vmatprep.mubr.f32.mxu0 %v958_v3  ;;  %410 = vmatprep.subr.mxu1 %v309_v46  ;;  %v1341_v34 = vld [vmem:[%s1679_s5 + $0x60] sm:$0xff]  ;;  %v1347_v35 = vld [vmem:[%s1679_s5 + $0xd8] sm:$0xff]  ;;  %v1359_v37 = vld [vmem:[%s1679_s5 + $0xd0] sm:$0xff] }
  0x22   :  { %411 = vmatpush1.msra.mxu1 %v308_v47  ;;  %813 = vmatprep.subr.mxu0 %v606_v27  ;;  %v1353_v36 = vld [vmem:[%s1679_s5 + $0x58] sm:$0xff]  ;;  %v1365_v38 = vld [vmem:[%s1679_s5 + $0x50] sm:$0xff]  ;;  %v1371_v39 = vld [vmem:[%s1679_s5 + $0xc8] sm:$0xff] }
  0x23   :  { %412 = vmatprep.subr.mxu1 %v307_v49  ;;  %814 = vmatpush3.msra.mxu0 %v1307_v28  ;;  %v1377_v40 = vld [vmem:[%s1679_s5 + $0x48] sm:$0xff]  ;;  %v1383_v41 = vld [vmem:[%s1679_s5 + $0xc0] sm:$0xff]  ;;  %v1401_v44 = vld [vmem:[%s1679_s5 + $0x38] sm:$0xff] }
  0x24   :  { %802 = vmatmul.mubr.msk.f32.gmra.mxu0 %vm64_vm0, %v32_v43  ;;  %413 = vmatpush1.msra.mxu1 %v306_v50  ;;  %v1389_v42 = vld [vmem:[%s1679_s5 + $0x40] sm:$0xff]  ;;  %v1395_v43 = vld [vmem:[%s1679_s5 + $0xb8] sm:$0xff]  ;;  %v1407_v45 = vld [vmem:[%s1679_s5 + $0xb0] sm:$0xff] }
  0x25   :  { %219 = vmatprep.mubr.f32.mxu0 %v958_v3  ;;  %414 = vmatprep.subr.mxu1 %v369_v51  ;;  %v1413_v46 = vld [vmem:[%s1679_s5 + $0x30] sm:$0xff]  ;;  %v1419_v47 = vld [vmem:[%s1679_s5 + $0xa8] sm:$0xff]  ;;  %v1431_v49 = vld [vmem:[%s1679_s5 + $0xa0] sm:$0xff] }
  0x26   :  { %415 = vmatpush2.msra.mxu1 %v368_v52  ;;  %815 = vmatprep.subr.mxu0 %v1312_v29  ;;  %v1437_v50 = vld [vmem:[%s1679_s5 + $0x20] sm:$0xff]  ;;  %v1443_v51 = vld [vmem:[%s1679_s5 + $0x98] sm:$0xff] }
  0x27   :  { %416 = vmatprep.subr.mxu1 %v367_v54  ;;  %816 = vmatpush3.msra.mxu0 %v1317_v30  ;;  %v1449_v52 = vld [vmem:[%s1679_s5 + $0x18] sm:$0xff]  ;;  %v54_v54 = vlaneseq }
  0x28   :  { %803 = vmatmul.mubr.msk.f32.gmra.mxu0 %vm64_vm0, %v33_v48  ;;  %417 = vmatpush2.msra.mxu1 %v366_v55  ;;  %v1425_v48 = vld [vmem:[%s1679_s5 + $0x28] sm:$0xff] }
  0x29   :  { %225 = vmatprep.mubr.f32.mxu0 %v958_v3  ;;  %418 = vmatprep.subr.mxu1 %v365_v56  ;;  %v1460_v55 = vshrl.u32 %v54_v54, 7 }
  0x2a   :  { %419 = vmatpush2.msra.mxu1 %v364_v57  ;;  %817 = vmatprep.subr.mxu0 %v1323_v31  ;;  %v52_v57 = vld [vmem:[%s1680_s2] sm:$0x3] }
  0x2b   :  { %420 = vmatprep.subr.mxu1 %v363_v59  ;;  %818 = vmatpush3.msra.mxu0 %v1329_v32  ;;  %v56_v56 = vsub.s32 0, %v1460_v55 }
  0x2c   :  { %804 = vmatmul.mubr.msk.f32.gmra.mxu0 %vm64_vm0, %v34_v53  ;;  %421 = vmatpush2.msra.mxu1 %v362_v60  ;;  %v1455_v53 = vld [vmem:[%s1679_s5 + $0x90] sm:$0xff] }
  0x2d   :  { %231 = vmatprep.mubr.f32.mxu0 %v958_v3  ;;  %422 = vmatprep.subr.mxu1 %v361_v61  ;;  %v1469_v59 = vrot.slane %v52_v57, %v56_v56 }
  0x2e   :  { %423 = vmatpush2.msra.mxu1 %v360_v62  ;;  %819 = vmatprep.subr.mxu0 %v1335_v33 }
  0x2f   :  { %424 = vmatprep.subr.mxu1 %v359_v0  ;;  %820 = vmatpush3.msra.mxu0 %v1341_v34 }
  0x30   :  { %805 = vmatmul.mubr.msk.f32.gmra.mxu0 %vm64_vm0, %v35_v58  ;;  %425 = vmatpush2.msra.mxu1 %v358_v1  ;;  %v60_v58 = vsub.s32 1, %v1460_v55 }
  0x31   :  { %237 = vmatprep.mubr.f32.mxu0 %v958_v3  ;;  %426 = vmatprep.subr.mxu1 %v357_v2 }
  0x32   :  { %427 = vmatpush2.msra.mxu1 %v356_v4  ;;  %821 = vmatprep.subr.mxu0 %v1347_v35  ;;  %v1473_v60 = vrot.slane %v52_v57, %v60_v58 }
  0x33   :  { %428 = vmatprep.subr.mxu1 %v355_v6  ;;  %822 = vmatpush3.msra.mxu0 %v1353_v36 }
  0x34   :  { %806 = vmatmul.mubr.msk.f32.gmra.mxu0 %vm64_vm0, %v36_v63  ;;  %429 = vmatpush2.msra.mxu1 %v354_v7 }
  0x35   :  { %243 = vmatprep.mubr.f32.mxu0 %v958_v3  ;;  %430 = vmatprep.subr.mxu1 %v353_v8 }
  0x36   :  { %431 = vmatpush2.msra.mxu1 %v352_v9  ;;  %823 = vmatprep.subr.mxu0 %v1359_v37 }
  0x37   :  { %432 = vmatprep.subr.mxu1 %v351_v11  ;;  %824 = vmatpush3.msra.mxu0 %v1365_v38 }
  0x38   :  { %807 = vmatmul.mubr.msk.f32.gmra.mxu0 %vm64_vm0, %v37_v5  ;;  %433 = vmatpush2.msra.mxu1 %v350_v12 }
  0x39   :  { %249 = vmatprep.mubr.f32.mxu0 %v958_v3  ;;  %434 = vmatprep.subr.mxu1 %v349_v13 }
  0x3a   :  { %435 = vmatpush2.msra.mxu1 %v348_v14  ;;  %825 = vmatprep.subr.mxu0 %v1371_v39 }
  0x3b   :  { %436 = vmatprep.subr.mxu1 %v347_v16  ;;  %826 = vmatpush3.msra.mxu0 %v1377_v40 }
  0x3c   :  { %808 = vmatmul.mubr.msk.f32.gmra.mxu0 %vm64_vm0, %v38_v10  ;;  %437 = vmatpush2.msra.mxu1 %v346_v17 }
  0x3d   :  { %255 = vmatprep.mubr.f32.mxu0 %v958_v3  ;;  %438 = vmatprep.subr.mxu1 %v345_v20 }
  0x3e   :  { %439 = vmatpush2.msra.mxu1 %v344_v21  ;;  %827 = vmatprep.subr.mxu0 %v1383_v41 }
  0x3f   :  { %828 = vmatpush3.msra.mxu0 %v1389_v42 }
  0x40   :  { %809 = vmatmul.mubr.msk.f32.gmra.mxu0 %vm64_vm0, %v39_v15  ;;  %829 = vmatprep.subr.mxu0 %v1395_v43 }
  0x41   :  { %261 = vmatprep.mubr.f32.mxu0 %v958_v3  ;;  %830 = vmatpush3.msra.mxu0 %v1401_v44 }
  0x42   :  { %831 = vmatprep.subr.mxu0 %v1407_v45 }
  0x43   :  { %832 = vmatpush3.msra.mxu0 %v1413_v46 }
  0x44   :  { %810 = vmatmul.mubr.msk.f32.gmra.mxu0 %vm64_vm0, %v40_v18  ;;  %833 = vmatprep.subr.mxu0 %v1419_v47 }
  0x45   :  { %267 = vmatprep.mubr.f32.mxu0 %v958_v3  ;;  %v343_v3 = vld [vmem:[%s1678_s3 + $0x128] sm:$0xff]  ;;  %834 = vmatpush3.msra.mxu0 %v1425_v48 }
  0x46   :  { %440 = vmatprep.subr.mxu1 %v343_v3  ;;  %835 = vmatprep.subr.mxu0 %v1431_v49 }
  0x47   :  { %441 = vmatpush2.msra.mxu1 %v342_v22  ;;  %836 = vmatpush3.msra.mxu0 %v1437_v50 }
  0x48   :  { %811 = vmatmul.mubr.msk.f32.gmra.mxu0 %vm64_vm0, %v41_v19  ;;  %442 = vmatprep.subr.mxu1 %v341_v23 }
  0x49   :  { %443 = vmatpush2.msra.mxu1 %v340_v24  ;;  %837 = vmatprep.subr.mxu0 %v1443_v51 }
  0x4a   :  { %444 = vmatprep.subr.mxu1 %v339_v25  ;;  %838 = vmatpush3.msra.mxu0 %v1449_v52 }
  0x4b   :  { %445 = vmatpush2.msra.mxu1 %v338_v26  ;;  %839 = vmatprep.subr.mxu0 %v1455_v53 }
  0x4c   :  { %893 = vmatprep.subr.mxu1 %v606_v27 }
  0xcc   :  { %v179_v61 = vpop.f32.mrf.mxu0 }
  0xcd   :  { %v180_v62 = vadd.f32 %v179_v61, %v1469_v59 }
  0xce   :  { %v181_v63 = vpop.f32.mrf.mxu0 }
  0xcf   :  { %v182_v0 = vadd.f32 %v181_v63, %v1473_v60  ;;  %v274_v4 = vmax.f32 %v180_v62, 0.0 }
  0xd0   :  { %v185_v1 = vpop.f32.mrf.mxu0 }
  0xd1   :  { %v275_v2 = vmax.f32 %v182_v0, 0.0  ;;  %v186_v5 = vadd.f32 %v185_v1, %v1469_v59 }
  0xd2   :  { %v187_v6 = vpop.f32.mrf.mxu0 }
  0xd3   :  { %v188_v7 = vadd.f32 %v187_v6, %v1473_v60  ;;  %446 = vmatprep.mubr.f32.mxu1 %v275_v2  ;;  %v276_v10 = vmax.f32 %v186_v5, 0.0 }
  0xd4   :  { %v191_v8 = vpop.f32.mrf.mxu0  ;;  %447 = vmatmul.mubr.f32.vlgmr.msra.gmra.mxu1 %v274_v4 }
  0xd5   :  { %v277_v9 = vmax.f32 %v188_v7, 0.0  ;;  %909 = vmatpush3.msra.mxu1 %v1307_v28  ;;  %v192_v11 = vadd.f32 %v191_v8, %v1469_v59 }
  0xd6   :  { %v193_v12 = vpop.f32.mrf.mxu0  ;;  %894 = vmatprep.subr.mxu1 %v1312_v29 }
  0xd7   :  { %v194_v13 = vadd.f32 %v193_v12, %v1473_v60  ;;  %452 = vmatprep.mubr.f32.mxu1 %v277_v9  ;;  %910 = vmatpush3.msra.mxu1 %v1317_v30  ;;  %v278_v16 = vmax.f32 %v192_v11, 0.0 }
  0xd8   :  { %v197_v14 = vpop.f32.mrf.mxu0  ;;  %453 = vmatmul.mubr.f32.gmra.mxu1 %v276_v10  ;;  %895 = vmatprep.subr.mxu1 %v1323_v31 }
  0xd9   :  { %v279_v15 = vmax.f32 %v194_v13, 0.0  ;;  %911 = vmatpush3.msra.mxu1 %v1329_v32  ;;  %v198_v17 = vadd.f32 %v197_v14, %v1469_v59 }
  0xda   :  { %v199_v18 = vpop.f32.mrf.mxu0  ;;  %896 = vmatprep.subr.mxu1 %v1335_v33 }
  0xdb   :  { %v200_v19 = vadd.f32 %v199_v18, %v1473_v60  ;;  %458 = vmatprep.mubr.f32.mxu1 %v279_v15  ;;  %912 = vmatpush3.msra.mxu1 %v1341_v34  ;;  %v280_v3 = vmax.f32 %v198_v17, 0.0 }
  0xdc   :  { %v203_v20 = vpop.f32.mrf.mxu0  ;;  %459 = vmatmul.mubr.f32.gmra.mxu1 %v278_v16  ;;  %897 = vmatprep.subr.mxu1 %v1347_v35 }
  0xdd   :  { %v281_v21 = vmax.f32 %v200_v19, 0.0  ;;  %913 = vmatpush3.msra.mxu1 %v1353_v36  ;;  %v204_v22 = vadd.f32 %v203_v20, %v1469_v59 }
  0xde   :  { %v205_v23 = vpop.f32.mrf.mxu0  ;;  %898 = vmatprep.subr.mxu1 %v1359_v37 }
  0xdf   :  { %v206_v24 = vadd.f32 %v205_v23, %v1473_v60  ;;  %464 = vmatprep.mubr.f32.mxu1 %v281_v21  ;;  %914 = vmatpush3.msra.mxu1 %v1365_v38  ;;  %v282_v27 = vmax.f32 %v204_v22, 0.0 }
  0xe0   :  { %v209_v25 = vpop.f32.mrf.mxu0  ;;  %465 = vmatmul.mubr.f32.gmra.mxu1 %v280_v3  ;;  %899 = vmatprep.subr.mxu1 %v1371_v39 }
  0xe1   :  { %v283_v26 = vmax.f32 %v206_v24, 0.0  ;;  %915 = vmatpush3.msra.mxu1 %v1377_v40  ;;  %v210_v28 = vadd.f32 %v209_v25, %v1469_v59 }
  0xe2   :  { %v211_v29 = vpop.f32.mrf.mxu0  ;;  %900 = vmatprep.subr.mxu1 %v1383_v41 }
  0xe3   :  { %v212_v30 = vadd.f32 %v211_v29, %v1473_v60  ;;  %470 = vmatprep.mubr.f32.mxu1 %v283_v26  ;;  %916 = vmatpush3.msra.mxu1 %v1389_v42  ;;  %v284_v33 = vmax.f32 %v210_v28, 0.0 }
  0xe4   :  { %v215_v31 = vpop.f32.mrf.mxu0  ;;  %471 = vmatmul.mubr.f32.gmra.mxu1 %v282_v27  ;;  %901 = vmatprep.subr.mxu1 %v1395_v43 }
  0xe5   :  { %v285_v32 = vmax.f32 %v212_v30, 0.0  ;;  %917 = vmatpush3.msra.mxu1 %v1401_v44  ;;  %v216_v34 = vadd.f32 %v215_v31, %v1469_v59 }
  0xe6   :  { %v217_v35 = vpop.f32.mrf.mxu0  ;;  %902 = vmatprep.subr.mxu1 %v1407_v45 }
  0xe7   :  { %v218_v36 = vadd.f32 %v217_v35, %v1473_v60  ;;  %476 = vmatprep.mubr.f32.mxu1 %v285_v32  ;;  %918 = vmatpush3.msra.mxu1 %v1413_v46  ;;  %v286_v39 = vmax.f32 %v216_v34, 0.0  ;;  %v577_v34 = vld [vmem:[%s1679_s5 + $0x10] sm:$0xff]  ;;  %v592_v35 = vld [vmem:[%s1679_s5 + $0x88] sm:$0xff] }
  0xe8   :  { %v221_v37 = vpop.f32.mrf.mxu0  ;;  %477 = vmatmul.mubr.f32.gmra.mxu1 %v284_v33  ;;  %903 = vmatprep.subr.mxu1 %v1419_v47 }
  0xe9   :  { %v287_v38 = vmax.f32 %v218_v36, 0.0  ;;  %919 = vmatpush3.msra.mxu1 %v1425_v48  ;;  %v222_v40 = vadd.f32 %v221_v37, %v1469_v59  ;;  %840 = vmatpush3.msra.mxu0 %v577_v34  ;;  %v575_v36 = vld [vmem:[%s1679_s5] sm:$0xff] }
  0xea   :  { %v223_v41 = vpop.f32.mrf.mxu0  ;;  %904 = vmatprep.subr.mxu1 %v1431_v49  ;;  %841 = vmatprep.subr.mxu0 %v592_v35  ;;  %v370_v37 = vld [vmem:[%s1681_s4] sm:$0x3] }
  0xeb   :  { %v224_v42 = vadd.f32 %v223_v41, %v1473_v60  ;;  %482 = vmatprep.mubr.f32.mxu1 %v287_v38  ;;  %920 = vmatpush3.msra.mxu1 %v1437_v50  ;;  %v288_v45 = vmax.f32 %v222_v40, 0.0  ;;  %v1553_v38 = vrot.slane %v370_v37, %v56_v56 }
  0xec   :  { %v227_v43 = vpop.f32.mrf.mxu0  ;;  %483 = vmatmul.mubr.f32.gmra.mxu1 %v286_v39  ;;  %905 = vmatprep.subr.mxu1 %v1443_v51  ;;  %v1557_v39 = vrot.slane %v370_v37, %v60_v58 }
  0xed   :  { %v289_v44 = vmax.f32 %v224_v42, 0.0  ;;  %921 = vmatpush3.msra.mxu1 %v1449_v52  ;;  %v228_v46 = vadd.f32 %v227_v43, %v1469_v59 }
  0xee   :  { %v229_v47 = vpop.f32.mrf.mxu0  ;;  %906 = vmatprep.subr.mxu1 %v1455_v53 }
  0xef   :  { %v230_v48 = vadd.f32 %v229_v47, %v1473_v60  ;;  %488 = vmatprep.mubr.f32.mxu1 %v289_v44  ;;  %v290_v50 = vmax.f32 %v228_v46, 0.0  ;;  %922 = vmatpush3.msra.mxu1 %v577_v34 }
  0xf0   :  { %v233_v49 = vpop.f32.mrf.mxu0  ;;  %489 = vmatmul.mubr.f32.gmra.mxu1 %v288_v45  ;;  %907 = vmatprep.subr.mxu1 %v592_v35 }
  0xf1   :  { %v291_v54 = vmax.f32 %v230_v48, 0.0  ;;  %v234_v57 = vadd.f32 %v233_v49, %v1469_v59 }
  0xf2   :  { %v235_v61 = vpop.f32.mrf.mxu0 }
  0xf3   :  { %v236_v51 = vadd.f32 %v235_v61, %v1473_v60  ;;  %494 = vmatprep.mubr.f32.mxu1 %v291_v54  ;;  %v292_v63 = vmax.f32 %v234_v57, 0.0 }
  0xf4   :  { %v239_v52 = vpop.f32.mrf.mxu0  ;;  %495 = vmatmul.mubr.f32.gmra.mxu1 %v290_v50 }
  0xf5   :  { %v293_v62 = vmax.f32 %v236_v51, 0.0  ;;  %v240_v0 = vadd.f32 %v239_v52, %v1469_v59 }
  0xf6   :  { %v241_v53 = vpop.f32.mrf.mxu0 }
  0xf7   :  { %v242_v1 = vadd.f32 %v241_v53, %v1473_v60  ;;  %500 = vmatprep.mubr.f32.mxu1 %v293_v62  ;;  %v294_v5 = vmax.f32 %v240_v0, 0.0 }
  0xf8   :  { %v245_v2 = vpop.f32.mrf.mxu0  ;;  %501 = vmatmul.mubr.f32.gmra.mxu1 %v292_v63 }
  0xf9   :  { %v295_v4 = vmax.f32 %v242_v1, 0.0  ;;  %v246_v6 = vadd.f32 %v245_v2, %v1469_v59 }
  0xfa   :  { %v247_v7 = vpop.f32.mrf.mxu0 }
  0xfb   :  { %v248_v8 = vadd.f32 %v247_v7, %v1473_v60  ;;  %506 = vmatprep.mubr.f32.mxu1 %v295_v4  ;;  %v296_v11 = vmax.f32 %v246_v6, 0.0 }
  0xfc   :  { %v251_v9 = vpop.f32.mrf.mxu0  ;;  %507 = vmatmul.mubr.f32.gmra.mxu1 %v294_v5 }
  0xfd   :  { %v297_v10 = vmax.f32 %v248_v8, 0.0  ;;  %v252_v12 = vadd.f32 %v251_v9, %v1469_v59 }
  0xfe   :  { %v253_v13 = vpop.f32.mrf.mxu0 }
  0xff   :  { %v254_v14 = vadd.f32 %v253_v13, %v1473_v60  ;;  %512 = vmatprep.mubr.f32.mxu1 %v297_v10  ;;  %v298_v17 = vmax.f32 %v252_v12, 0.0 }
 0x100   :  { %v257_v15 = vpop.f32.mrf.mxu0  ;;  %513 = vmatmul.mubr.f32.gmra.mxu1 %v296_v11 }
 0x101   :  { %v299_v16 = vmax.f32 %v254_v14, 0.0  ;;  %v258_v18 = vadd.f32 %v257_v15, %v1469_v59 }
 0x102   :  { %v259_v19 = vpop.f32.mrf.mxu0 }
 0x103   :  { %v260_v20 = vadd.f32 %v259_v19, %v1473_v60  ;;  %518 = vmatprep.mubr.f32.mxu1 %v299_v16  ;;  %v300_v22 = vmax.f32 %v258_v18, 0.0 }
 0x104   :  { %v263_v21 = vpop.f32.mrf.mxu0  ;;  %519 = vmatmul.mubr.f32.gmra.mxu1 %v298_v17 }
 0x105   :  { %v301_v3 = vmax.f32 %v260_v20, 0.0  ;;  %v264_v23 = vadd.f32 %v263_v21, %v1469_v59 }
 0x106   :  { %v265_v24 = vpop.f32.mrf.mxu0 }
 0x107   :  { %v266_v25 = vadd.f32 %v265_v24, %v1473_v60  ;;  %524 = vmatprep.mubr.f32.mxu1 %v301_v3  ;;  %v302_v28 = vmax.f32 %v264_v23, 0.0 }
 0x108   :  { %v269_v26 = vpop.f32.mrf.mxu0  ;;  %525 = vmatmul.mubr.f32.gmra.mxu1 %v300_v22 }
 0x109   :  { %v303_v27 = vmax.f32 %v266_v25, 0.0  ;;  %v270_v29 = vadd.f32 %v269_v26, %v1469_v59  ;;  %v576_v59 = vld [vmem:[%s1679_s5 + $0x8] sm:$0xff] }
 0x10a   :  { %v271_v30 = vpop.f32.mrf.mxu0  ;;  %842 = vmatpush3.msra.mxu0 %v576_v59  ;;  %923 = vmatpush3.msra.mxu1 %v576_v59 }
 0x10b   :  { %v272_v31 = vadd.f32 %v271_v30, %v1473_v60  ;;  %530 = vmatprep.mubr.f32.mxu1 %v303_v27  ;;  %v304_v33 = vmax.f32 %v270_v29, 0.0  ;;  %v591_v60 = vld [vmem:[%s1679_s5 + $0x80] sm:$0xff] }
 0x10c   :  { %531 = vmatmul.mubr.f32.gmra.mxu1 %v302_v28  ;;  %843 = vmatprep.subr.mxu0 %v591_v60 }
 0x10d   :  { %v305_v32 = vmax.f32 %v272_v31, 0.0  ;;  %908 = vmatprep.subr.mxu1 %v591_v60  ;;  %844 = vmatpush3.msra.mxu0 %v575_v36 }
 0x10e   :  { %924 = vmatpush3.msra.mxu1 %v575_v36 }
 0x10f   :  { %536 = vmatprep.mubr.f32.mxu1 %v305_v32 }
 0x110   :  { %537 = vmatmul.mubr.f32.gmra.mxu1 %v304_v33 }
 0x194   :  { %v448_v40 = vpop.f32.mrf.mxu1 }
 0x195   :  { %v449_v41 = vadd.f32 %v448_v40, %v1553_v38 }
 0x196   :  { %v450_v42 = vpop.f32.mrf.mxu1 }
 0x197   :  { %v451_v43 = vadd.f32 %v450_v42, %v1557_v39  ;;  %v543_v46 = vmax.f32 %v449_v41, 0.0 }
 0x198   :  { %v454_v44 = vpop.f32.mrf.mxu1 }
 0x199   :  { %v544_v45 = vmax.f32 %v451_v43, 0.0  ;;  %v455_v47 = vadd.f32 %v454_v44, %v1553_v38 }
 0x19a   :  { %v456_v48 = vpop.f32.mrf.mxu1 }
 0x19b   :  { %v457_v49 = vadd.f32 %v456_v48, %v1557_v39  ;;  %678 = vmatprep.mubr.f32.mxu0 %v544_v45  ;;  %v545_v58 = vmax.f32 %v455_v47, 0.0 }
 0x19c   :  { %v460_v56 = vpop.f32.mrf.mxu1  ;;  %679 = vmatmul.mubr.f32.vlgmr.msra.gmra.mxu0 %v543_v46 }
 0x19d   :  { %v546_v55 = vmax.f32 %v457_v49, 0.0  ;;  %v461_v54 = vadd.f32 %v460_v56, %v1553_v38 }
 0x19e   :  { %v462_v50 = vpop.f32.mrf.mxu1 }
 0x19f   :  { %v463_v57 = vadd.f32 %v462_v50, %v1557_v39  ;;  %683 = vmatprep.mubr.f32.mxu0 %v546_v55  ;;  %v547_v52 = vmax.f32 %v461_v54, 0.0 }
 0x1a0   :  { %v466_v61 = vpop.f32.mrf.mxu1  ;;  %684 = vmatmul.mubr.f32.gmra.mxu0 %v545_v58 }
 0x1a1   :  { %v548_v51 = vmax.f32 %v463_v57, 0.0  ;;  %v467_v62 = vadd.f32 %v466_v61, %v1553_v38 }
 0x1a2   :  { %v468_v63 = vpop.f32.mrf.mxu1 }
 0x1a3   :  { %v469_v0 = vadd.f32 %v468_v63, %v1557_v39  ;;  %688 = vmatprep.mubr.f32.mxu0 %v548_v51  ;;  %v549_v2 = vmax.f32 %v467_v62, 0.0 }
 0x1a4   :  { %v472_v53 = vpop.f32.mrf.mxu1  ;;  %689 = vmatmul.mubr.f32.gmra.mxu0 %v547_v52 }
 0x1a5   :  { %v550_v1 = vmax.f32 %v469_v0, 0.0  ;;  %v473_v4 = vadd.f32 %v472_v53, %v1553_v38 }
 0x1a6   :  { %v474_v5 = vpop.f32.mrf.mxu1 }
 0x1a7   :  { %v475_v6 = vadd.f32 %v474_v5, %v1557_v39  ;;  %693 = vmatprep.mubr.f32.mxu0 %v550_v1  ;;  %v551_v9 = vmax.f32 %v473_v4, 0.0 }
 0x1a8   :  { %v478_v7 = vpop.f32.mrf.mxu1  ;;  %694 = vmatmul.mubr.f32.gmra.mxu0 %v549_v2 }
 0x1a9   :  { %v552_v8 = vmax.f32 %v475_v6, 0.0  ;;  %v479_v10 = vadd.f32 %v478_v7, %v1553_v38 }
 0x1aa   :  { %v480_v11 = vpop.f32.mrf.mxu1 }
 0x1ab   :  { %v481_v12 = vadd.f32 %v480_v11, %v1557_v39  ;;  %698 = vmatprep.mubr.f32.mxu0 %v552_v8  ;;  %v553_v15 = vmax.f32 %v479_v10, 0.0 }
 0x1ac   :  { %v484_v13 = vpop.f32.mrf.mxu1  ;;  %699 = vmatmul.mubr.f32.gmra.mxu0 %v551_v9 }
 0x1ad   :  { %v554_v14 = vmax.f32 %v481_v12, 0.0  ;;  %v485_v16 = vadd.f32 %v484_v13, %v1553_v38 }
 0x1ae   :  { %v486_v17 = vpop.f32.mrf.mxu1 }
 0x1af   :  { %v487_v18 = vadd.f32 %v486_v17, %v1557_v39  ;;  %703 = vmatprep.mubr.f32.mxu0 %v554_v14  ;;  %v555_v21 = vmax.f32 %v485_v16, 0.0  ;;  %v1594_v14 = vld [vmem:[%s1682_s6] ss:$0 sm:$0xff] }
 0x1b0   :  { %v490_v19 = vpop.f32.mrf.mxu1  ;;  %704 = vmatmul.mubr.f32.gmra.mxu0 %v553_v15 }
 0x1b1   :  { %v556_v20 = vmax.f32 %v487_v18, 0.0  ;;  %v491_v3 = vadd.f32 %v490_v19, %v1553_v38 }
 0x1b2   :  { %v492_v22 = vpop.f32.mrf.mxu1 }
 0x1b3   :  { %v493_v23 = vadd.f32 %v492_v22, %v1557_v39  ;;  %708 = vmatprep.mubr.f32.mxu0 %v556_v20  ;;  %v557_v26 = vmax.f32 %v491_v3, 0.0 }
 0x1b4   :  { %v496_v24 = vpop.f32.mrf.mxu1  ;;  %709 = vmatmul.mubr.f32.gmra.mxu0 %v555_v21 }
 0x1b5   :  { %v558_v25 = vmax.f32 %v493_v23, 0.0  ;;  %v497_v27 = vadd.f32 %v496_v24, %v1553_v38 }
 0x1b6   :  { %v498_v28 = vpop.f32.mrf.mxu1 }
 0x1b7   :  { %v499_v29 = vadd.f32 %v498_v28, %v1557_v39  ;;  %713 = vmatprep.mubr.f32.mxu0 %v558_v25  ;;  %v559_v32 = vmax.f32 %v497_v27, 0.0 }
 0x1b8   :  { %v502_v30 = vpop.f32.mrf.mxu1  ;;  %714 = vmatmul.mubr.f32.gmra.mxu0 %v557_v26 }
 0x1b9   :  { %v560_v31 = vmax.f32 %v499_v29, 0.0  ;;  %v503_v33 = vadd.f32 %v502_v30, %v1553_v38 }
 0x1ba   :  { %v504_v34 = vpop.f32.mrf.mxu1 }
 0x1bb   :  { %v505_v35 = vadd.f32 %v504_v34, %v1557_v39  ;;  %718 = vmatprep.mubr.f32.mxu0 %v560_v31  ;;  %v561_v36 = vmax.f32 %v503_v33, 0.0 }
 0x1bc   :  { %v508_v59 = vpop.f32.mrf.mxu1  ;;  %719 = vmatmul.mubr.f32.gmra.mxu0 %v559_v32 }
 0x1bd   :  { %v562_v60 = vmax.f32 %v505_v35, 0.0  ;;  %v509_v37 = vadd.f32 %v508_v59, %v1553_v38 }
 0x1be   :  { %v510_v40 = vpop.f32.mrf.mxu1 }
 0x1bf   :  { %v511_v41 = vadd.f32 %v510_v40, %v1557_v39  ;;  %723 = vmatprep.mubr.f32.mxu0 %v562_v60  ;;  %v563_v44 = vmax.f32 %v509_v37, 0.0 }
 0x1c0   :  { %v514_v42 = vpop.f32.mrf.mxu1  ;;  %724 = vmatmul.mubr.f32.gmra.mxu0 %v561_v36 }
 0x1c1   :  { %v564_v43 = vmax.f32 %v511_v41, 0.0  ;;  %v515_v45 = vadd.f32 %v514_v42, %v1553_v38 }
 0x1c2   :  { %v516_v46 = vpop.f32.mrf.mxu1 }
 0x1c3   :  { %v517_v47 = vadd.f32 %v516_v46, %v1557_v39  ;;  %728 = vmatprep.mubr.f32.mxu0 %v564_v43  ;;  %v565_v56 = vmax.f32 %v515_v45, 0.0 }
 0x1c4   :  { %v520_v48 = vpop.f32.mrf.mxu1  ;;  %729 = vmatmul.mubr.f32.gmra.mxu0 %v563_v44 }
 0x1c5   :  { %v566_v49 = vmax.f32 %v517_v47, 0.0  ;;  %v521_v55 = vadd.f32 %v520_v48, %v1553_v38 }
 0x1c6   :  { %v522_v58 = vpop.f32.mrf.mxu1 }
 0x1c7   :  { %v523_v54 = vadd.f32 %v522_v58, %v1557_v39  ;;  %733 = vmatprep.mubr.f32.mxu0 %v566_v49  ;;  %v567_v61 = vmax.f32 %v521_v55, 0.0 }
 0x1c8   :  { %v526_v50 = vpop.f32.mrf.mxu1  ;;  %734 = vmatmul.mubr.f32.gmra.mxu0 %v565_v56 }
 0x1c9   :  { %v568_v57 = vmax.f32 %v523_v54, 0.0  ;;  %v527_v51 = vadd.f32 %v526_v50, %v1553_v38 }
 0x1ca   :  { %v528_v52 = vpop.f32.mrf.mxu1 }
 0x1cb   :  { %v529_v62 = vadd.f32 %v528_v52, %v1557_v39  ;;  %738 = vmatprep.mubr.f32.mxu0 %v568_v57  ;;  %v569_v53 = vmax.f32 %v527_v51, 0.0 }
 0x1cc   :  { %v532_v63 = vpop.f32.mrf.mxu1  ;;  %739 = vmatmul.mubr.f32.gmra.mxu0 %v567_v61 }
 0x1cd   :  { %v570_v0 = vmax.f32 %v529_v62, 0.0  ;;  %v533_v1 = vadd.f32 %v532_v63, %v1553_v38 }
 0x1ce   :  { %v534_v2 = vpop.f32.mrf.mxu1 }
 0x1cf   :  { %v535_v4 = vadd.f32 %v534_v2, %v1557_v39  ;;  %743 = vmatprep.mubr.f32.mxu0 %v570_v0  ;;  %v571_v7 = vmax.f32 %v533_v1, 0.0 }
 0x1d0   :  { %v538_v5 = vpop.f32.mrf.mxu1  ;;  %744 = vmatmul.mubr.f32.gmra.mxu0 %v569_v53 }
 0x1d1   :  { %v572_v6 = vmax.f32 %v535_v4, 0.0  ;;  %v539_v8 = vadd.f32 %v538_v5, %v1553_v38 }
 0x1d2   :  { %v540_v9 = vpop.f32.mrf.mxu1 }
 0x1d3   :  { %v541_v10 = vadd.f32 %v540_v9, %v1557_v39  ;;  %748 = vmatprep.mubr.f32.mxu0 %v572_v6  ;;  %v573_v12 = vmax.f32 %v539_v8, 0.0 }
 0x1d4   :  { %749 = vmatmul.mubr.f32.gmra.mxu0 %v571_v7 }
 0x1d5   :  { %v574_v11 = vmax.f32 %v541_v10, 0.0 }
 0x1d7   :  { %753 = vmatprep.mubr.f32.mxu1 %v574_v11 }
 0x1d8   :  { %754 = vmatmul.mubr.f32.vlgmr.msra.gmra.mxu1 %v573_v12 }
 0x25c   :  { %v845_v13 = vpop.f32.mrf.mxu0 }
 0x25e   :  { %v846_v15 = vpop.f32.mrf.mxu0 }
 0x25f   :  { %v847_v16 = vadd.f32 %v846_v15, %v845_v13 }
 0x260   :  { %v848_v17 = vpop.f32.mrf.mxu0 }
 0x261   :  { %v681_v38 = vadd.f32 %v847_v16, %v1594_v14 }
 0x262   :  { %v849_v18 = vpop.f32.mrf.mxu0 }
 0x263   :  { %926 = vtanh.f32 %v681_v38  ;;  %v850_v39 = vadd.f32 %v849_v18, %v848_v17 }
 0x264   :  { %v851_v19 = vpop.f32.mrf.mxu0 }
 0x265   :  { %v686_v20 = vadd.f32 %v850_v39, %v1594_v14 }
 0x266   :  { %v852_v21 = vpop.f32.mrf.mxu0 }
 0x267   :  { %928 = vtanh.f32 %v686_v20  ;;  %v853_v3 = vadd.f32 %v852_v21, %v851_v19 }
 0x268   :  { %v854_v22 = vpop.f32.mrf.mxu0 }
 0x269   :  { %v691_v23 = vadd.f32 %v853_v3, %v1594_v14 }
 0x26a   :  { %v855_v24 = vpop.f32.mrf.mxu0 }
 0x26b   :  { %930 = vtanh.f32 %v691_v23  ;;  %v856_v25 = vadd.f32 %v855_v24, %v854_v22 }
 0x26c   :  { %v857_v26 = vpop.f32.mrf.mxu0 }
 0x26d   :  { %v696_v27 = vadd.f32 %v856_v25, %v1594_v14 }
 0x26e   :  { %v858_v28 = vpop.f32.mrf.mxu0 }
 0x26f   :  { %932 = vtanh.f32 %v696_v27  ;;  %v859_v29 = vadd.f32 %v858_v28, %v857_v26 }
 0x270   :  { %v927_v30 = vpop.eup %926  ;;  %v860_v31 = vpop.f32.mrf.mxu0 }
 0x271   :  { %776 = vst.msk [vmem:[%s1683_s7] sm:$0xff] %vm775_vm1, %v927_v30  ;;  %v701_v32 = vadd.f32 %v859_v29, %v1594_v14 }
 0x272   :  { %v861_v33 = vpop.f32.mrf.mxu0 }
 0x273   :  { %934 = vtanh.f32 %v701_v32  ;;  %v862_v34 = vadd.f32 %v861_v33, %v860_v31 }
 0x274   :  { %v929_v35 = vpop.eup %928  ;;  %v863_v59 = vpop.f32.mrf.mxu0 }
 0x275   :  { %777 = vst.msk [vmem:[%s1683_s7 + $0x8] sm:$0xff] %vm775_vm1, %v929_v35  ;;  %v706_v60 = vadd.f32 %v862_v34, %v1594_v14 }
 0x276   :  { %v864_v36 = vpop.f32.mrf.mxu0 }
 0x277   :  { %936 = vtanh.f32 %v706_v60  ;;  %v865_v37 = vadd.f32 %v864_v36, %v863_v59 }
 0x278   :  { %v931_v40 = vpop.eup %930  ;;  %v866_v41 = vpop.f32.mrf.mxu0 }
 0x279   :  { %778 = vst.msk [vmem:[%s1683_s7 + $0x10] sm:$0xff] %vm775_vm1, %v931_v40  ;;  %v711_v42 = vadd.f32 %v865_v37, %v1594_v14 }
 0x27a   :  { %v867_v43 = vpop.f32.mrf.mxu0 }
 0x27b   :  { %938 = vtanh.f32 %v711_v42  ;;  %v868_v44 = vadd.f32 %v867_v43, %v866_v41 }
 0x27c   :  { %v933_v45 = vpop.eup %932  ;;  %v869_v46 = vpop.f32.mrf.mxu0 }
 0x27d   :  { %779 = vst.msk [vmem:[%s1683_s7 + $0x18] sm:$0xff] %vm775_vm1, %v933_v45  ;;  %v716_v47 = vadd.f32 %v868_v44, %v1594_v14 }
 0x27e   :  { %v870_v48 = vpop.f32.mrf.mxu0 }
 0x27f   :  { %940 = vtanh.f32 %v716_v47  ;;  %v871_v49 = vadd.f32 %v870_v48, %v869_v46 }
 0x280   :  { %v935_v56 = vpop.eup %934  ;;  %v872_v55 = vpop.f32.mrf.mxu0 }
 0x281   :  { %780 = vst.msk [vmem:[%s1683_s7 + $0x20] sm:$0xff] %vm775_vm1, %v935_v56  ;;  %v721_v58 = vadd.f32 %v871_v49, %v1594_v14 }
 0x282   :  { %v873_v54 = vpop.f32.mrf.mxu0 }
 0x283   :  { %942 = vtanh.f32 %v721_v58  ;;  %v874_v50 = vadd.f32 %v873_v54, %v872_v55 }
 0x284   :  { %v937_v57 = vpop.eup %936  ;;  %v875_v61 = vpop.f32.mrf.mxu0 }
 0x285   :  { %781 = vst.msk [vmem:[%s1683_s7 + $0x28] sm:$0xff] %vm775_vm1, %v937_v57  ;;  %v726_v51 = vadd.f32 %v874_v50, %v1594_v14 }
 0x286   :  { %v876_v52 = vpop.f32.mrf.mxu0 }
 0x287   :  { %944 = vtanh.f32 %v726_v51  ;;  %v877_v62 = vadd.f32 %v876_v52, %v875_v61 }
 0x288   :  { %v939_v63 = vpop.eup %938  ;;  %v878_v0 = vpop.f32.mrf.mxu0 }
 0x289   :  { %782 = vst.msk [vmem:[%s1683_s7 + $0x30] sm:$0xff] %vm775_vm1, %v939_v63  ;;  %v731_v53 = vadd.f32 %v877_v62, %v1594_v14 }
 0x28a   :  { %v879_v1 = vpop.f32.mrf.mxu0 }
 0x28b   :  { %946 = vtanh.f32 %v731_v53  ;;  %v880_v2 = vadd.f32 %v879_v1, %v878_v0 }
 0x28c   :  { %v941_v4 = vpop.eup %940  ;;  %v881_v5 = vpop.f32.mrf.mxu0 }
 0x28d   :  { %783 = vst.msk [vmem:[%s1683_s7 + $0x38] sm:$0xff] %vm775_vm1, %v941_v4  ;;  %v736_v6 = vadd.f32 %v880_v2, %v1594_v14 }
 0x28e   :  { %v882_v7 = vpop.f32.mrf.mxu0 }
 0x28f   :  { %948 = vtanh.f32 %v736_v6  ;;  %v883_v8 = vadd.f32 %v882_v7, %v881_v5 }
 0x290   :  { %v943_v9 = vpop.eup %942  ;;  %v884_v10 = vpop.f32.mrf.mxu0 }
 0x291   :  { %784 = vst.msk [vmem:[%s1683_s7 + $0x40] sm:$0xff] %vm775_vm1, %v943_v9  ;;  %v741_v11 = vadd.f32 %v883_v8, %v1594_v14 }
 0x292   :  { %v885_v12 = vpop.f32.mrf.mxu0 }
 0x293   :  { %950 = vtanh.f32 %v741_v11  ;;  %v886_v13 = vadd.f32 %v885_v12, %v884_v10 }
 0x294   :  { %v945_v15 = vpop.eup %944  ;;  %v887_v16 = vpop.f32.mrf.mxu0 }
 0x295   :  { %785 = vst.msk [vmem:[%s1683_s7 + $0x48] sm:$0xff] %vm775_vm1, %v945_v15  ;;  %v746_v17 = vadd.f32 %v886_v13, %v1594_v14 }
 0x296   :  { %v888_v38 = vpop.f32.mrf.mxu0 }
 0x297   :  { %952 = vtanh.f32 %v746_v17  ;;  %v889_v18 = vadd.f32 %v888_v38, %v887_v16 }
 0x298   :  { %v947_v39 = vpop.eup %946  ;;  %v890_v19 = vpop.f32.mrf.mxu1 }
 0x299   :  { %786 = vst.msk [vmem:[%s1683_s7 + $0x50] sm:$0xff] %vm775_vm1, %v947_v39  ;;  %v751_v20 = vadd.f32 %v889_v18, %v1594_v14 }
 0x29a   :  { %v891_v21 = vpop.f32.mrf.mxu1 }
 0x29b   :  { %954 = vtanh.f32 %v751_v20  ;;  %v892_v3 = vadd.f32 %v891_v21, %v890_v19 }
 0x29c   :  { %v949_v22 = vpop.eup %948 }
 0x29d   :  { %787 = vst.msk [vmem:[%s1683_s7 + $0x58] sm:$0xff] %vm775_vm1, %v949_v22  ;;  %v756_v23 = vadd.f32 %v892_v3, %v1594_v14 }
 0x29f   :  { %956 = vtanh.f32 %v756_v23 }
 0x2a0   :  { %v951_v24 = vpop.eup %950 }
 0x2a1   :  { %788 = vst.msk [vmem:[%s1683_s7 + $0x60] sm:$0xff] %vm775_vm1, %v951_v24 }
 0x2a4   :  { %v953_v25 = vpop.eup %952 }
 0x2a5   :  { %789 = vst.msk [vmem:[%s1683_s7 + $0x68] sm:$0xff] %vm775_vm1, %v953_v25 }
 0x2a8   :  { %v955_v26 = vpop.eup %954 }
 0x2a9   :  { %790 = vst.msk [vmem:[%s1683_s7 + $0x70] sm:$0xff] %vm775_vm1, %v955_v26 }
 0x2ac   :  { %v957_v14 = vpop.eup %956 }
 0x2ad   :  { %791 = vst.msk [vmem:[%s1683_s7 + $0x78] sm:$0xff] %vm775_vm1, %v957_v14 }

</bundles_post_ra>
